<compile_context>
chip_gen: v6e
topology: v6e:2x2x1
jax: 0.10.0
libtpu: 0.0.40
codegen_flags: <defaults>
</compile_context>

<pallas_src>
import numpy as np
import jax
import jax.numpy as jnp
from jax.experimental import pallas as pl
from jax.experimental.pallas import tpu as pltpu


_LANE = 1024        # lane-dense last dim of the slab (multiple of 128)
_ROW_BLOCK = 512    # rows per tile -> 512*1024*4B = 2 MiB per f32 tile


# ---------------------------------------------------------------------------
# Pallas kernels (elementwise hot path)
# ---------------------------------------------------------------------------
def _make_quant_kernel(act_func: bool):
    # scal_ref (SMEM, shape (3,)): [1/softplus(a), nlvs-1, softplus(c)/(nlvs-1)]
    def kernel(scal_ref, x_ref, o_ref):
        x = x_ref[...]
        if act_func:
            x = jnp.maximum(x, 0.0)                      # F.relu
        inv_a = scal_ref[0]
        nm1 = scal_ref[1]
        c_over_nm1 = scal_ref[2]
        y = jnp.clip(x * inv_a, 0.0, 1.0)                # F.hardtanh(x/a, 0, 1)
        # torch.round and jnp.round both use round-half-to-even
        o_ref[...] = jnp.round(y * nm1) * c_over_nm1

    return kernel


def _make_bypass_kernel(act_func: bool):
    def kernel(x_ref, o_ref):
        x = x_ref[...]
        o_ref[...] = jnp.maximum(x, 0.0) if act_func else x

    return kernel


# ---------------------------------------------------------------------------
# Launch helper: lane-dense slab + 1-D grid, double-buffered by BlockSpec
# ---------------------------------------------------------------------------
def _launch(kernel, x2, scalar_args=()):
    rows, lane = x2.shape
    # Row tile: multiple of 8 when tiling, or the full (possibly small) extent.
    tm = _ROW_BLOCK if rows >= _ROW_BLOCK else rows
    grid = (pl.cdiv(rows, tm),)
    data_spec = pl.BlockSpec((tm, lane), lambda i: (i, 0))
    smem_spec = pl.BlockSpec(memory_space=pltpu.MemorySpace.SMEM)
    in_specs = [smem_spec] * len(scalar_args) + [data_spec]
    return pl.pallas_call(
        kernel,
        out_shape=jax.ShapeDtypeStruct(x2.shape, x2.dtype),
        grid=grid,
        in_specs=in_specs,
        out_specs=data_spec,
        compiler_params=pltpu.CompilerParams(
            dimension_semantics=("parallel",)),   # lets v7x use both TCs
    )(*scalar_args, x2)


# ---------------------------------------------------------------------------
# Module wrapper (parameter handling is glue, compute lives in the kernels)
# ---------------------------------------------------------------------------
class QReLUPallas:
    def __init__(self, act_func=True, inplace=False):
        # Matches nn.Module __init__: bits = [32], a = (1,), c = (1,)
        self.bits = np.array([32.0], dtype=np.float32)
        self.a = np.ones((1,), dtype=np.float32)
        self.c = np.ones((1,), dtype=np.float32)
        self.act_func = act_func
        self.inplace = inplace  # no-op in a functional setting

    def initialize(self, bits, offset, diff):
        self.bits = np.asarray(bits, dtype=np.float32)
        v = np.log(np.exp(offset + diff) - 1.0)
        self.a = np.full((len(self.bits),), v, dtype=np.float32)
        self.c = np.full((len(self.bits),), v, dtype=np.float32)

    def initialize_qonly(self, offset, diff):
        v = np.log(np.exp(offset + diff) - 1.0)
        self.a = np.full_like(self.a, v)
        self.c = np.full_like(self.c, v)

    def _to_slab(self, x):
        """Flatten to a lane-dense (rows, _LANE) slab, zero-padding the tail."""
        total = x.size
        rows = (total + _LANE - 1) // _LANE
        padded = rows * _LANE
        xf = x.reshape(-1)
        if padded != total:
            xf = jnp.pad(xf, (0, padded - total))
        return xf.reshape(rows, _LANE), total

    def __call__(self, x):
        orig_shape = x.shape
        x = jnp.asarray(x, jnp.float32)
        x2, total = self._to_slab(x)

        if len(self.bits) == 1 and float(self.bits[0]) == 32.0:
            # 32-bit bypass path: (optional) ReLU only.
            # NOTE: in a real model let XLA fuse this ReLU into the producer
            # (or alias in/out); kept as a tiled Pallas kernel here for parity.
            out2 = _launch(_make_bypass_kernel(self.act_func), x2)
            return out2.reshape(-1)[:total].reshape(orig_shape)

        # TODO(synk): multi-bit (len(bits) > 1) relies on PyTorch broadcasting a
        # length-K vector against the last tensor dim; only the scalar case
        # (len(bits) == 1) is implemented here.
        assert len(self.bits) == 1, "only len(bits) == 1 supported"

        # Parameter transforms + folding (glue, not the hot path):
        a_soft = jnp.log1p(jnp.exp(jnp.asarray(self.a, jnp.float32)))[0]   # softplus(a)
        c_soft = jnp.log1p(jnp.exp(jnp.asarray(self.c, jnp.float32)))[0]   # softplus(c)
        nm1 = jnp.power(2.0, jnp.asarray(self.bits, jnp.float32))[0] - 1.0  # 2**bits - 1
        scalars = jnp.stack([1.0 / a_soft, nm1, c_soft / nm1]).astype(jnp.float32)

        out2 = _launch(_make_quant_kernel(self.act_func), x2, (scalars,))
        return out2.reshape(-1)[:total].reshape(orig_shape)


# ---------------------------------------------------------------------------
# Pure-JAX reference (exact PyTorch op order) for sanity checks
# ---------------------------------------------------------------------------
def _ref_forward(x, bits, a, c, act_func=True):
    if act_func:
        x = jnp.maximum(x, 0.0)
    if len(bits) == 1 and float(bits[0]) == 32.0:
        return x
    a_s = jnp.log1p(jnp.exp(jnp.asarray(a, jnp.float32)))[0]
    c_s = jnp.log1p(jnp.exp(jnp.asarray(c, jnp.float32)))[0]
    nm1 = jnp.power(2.0, jnp.asarray(bits, jnp.float32))[0] - 1.0
    xh = jnp.clip(x / a_s, 0.0, 1.0)
    return jnp.round(xh * nm1) / nm1 * c_s


if __name__ == "__main__":
    key = jax.random.PRNGKey(0)
    x = jax.random.normal(key, (2, 4, 16, 16), dtype=jnp.float32)

    # Path 1: default construction -> bits == [32] -> bypass (ReLU only).
    mod = QReLUPallas(act_func=True)
    y_bypass = jax.block_until_ready(mod(x))
    ref_bypass = _ref_forward(x, mod.bits, mod.a, mod.c, act_func=True)
    assert bool(jnp.array_equal(y_bypass, ref_bypass)), "bypass path mismatch"

    # Path 2: quantization path after initialize(bits=[4], offset, diff).
    mod.initialize([4.0], offset=0.1, diff=0.9)
    y_quant = jax.block_until_ready(mod(x))
    ref_quant = _ref_forward(x, mod.bits, mod.a, mod.c, act_func=True)

    c_soft = jnp.log1p(jnp.exp(jnp.asarray(mod.c, jnp.float32)))[0]
    nm1 = jnp.power(2.0, jnp.asarray(mod.bits, jnp.float32))[0] - 1.0
    step = float(c_soft / nm1)  # one quantization level
    diff = jnp.abs(y_quant - ref_quant)
    # Folded scalars may (rarely) flip a value sitting exactly on a round-half
    # boundary by one level; everything else is ULP-level identical.
    assert float(jnp.max(diff)) <= step + 1e-5, "quant path mismatch"
    assert float(jnp.mean(diff > 1e-5)) <= 1e-3, "quant path mismatch (too many off)"

    # Path 3: a shape whose flat size is NOT a multiple of the lane width
    # (exercises the zero-pad + slice path).
    x_odd = jax.random.normal(jax.random.PRNGKey(1), (2, 3, 7, 7), dtype=jnp.float32)
    y_odd = jax.block_until_ready(mod(x_odd))
    ref_odd = _ref_forward(x_odd, mod.bits, mod.a, mod.c, act_func=True)
    d_odd = jnp.abs(y_odd - ref_odd)
    assert float(jnp.max(d_odd)) <= step + 1e-5, "padded-tail path mismatch"

    print("KERNEL_OK")
</pallas_src>

<mosaic_0001>
module attributes {stable_mosaic.version = 11 : i64} {
  func.func @kernel(%arg0: i32, %arg1: memref<2x1024xf32, #tpu.memory_space<vmem>>, %arg2: memref<2x1024xf32, #tpu.memory_space<vmem>>) attributes {dimension_semantics = [#tpu.dimension_semantics<parallel>], iteration_bounds = array<i64: 1>, scalar_prefetch = 0 : i64, scratch_operands = 0 : i64, tpu.core_type = #tpu.core_type<tc>, window_params = [{transform_indices = @transform_0, window_bounds = array<i64: 2, 1024>}, {transform_indices = @transform_1, window_bounds = array<i64: 2, 1024>}]} {
    %c0 = arith.constant 0 : index
    %c0_0 = arith.constant 0 : index
    %0 = vector.load %arg1[%c0, %c0_0] : memref<2x1024xf32, #tpu.memory_space<vmem>>, vector<2x1024xf32>
    %cst = arith.constant 0.000000e+00 : f32
    %1 = vector.broadcast %cst : f32 to vector<2x1024xf32>
    %2 = arith.maximumf %0, %1 : vector<2x1024xf32>
    %c0_1 = arith.constant 0 : index
    %c0_2 = arith.constant 0 : index
    %3 = vector.load %arg2[%c0_1, %c0_2] : memref<2x1024xf32, #tpu.memory_space<vmem>>, vector<2x1024xf32>
    tpu.vector_store %arg2[%c0_1, %c0_2], %2 {strides = array<i32>} : memref<2x1024xf32, #tpu.memory_space<vmem>>, vector<2x1024xf32>,
    return
  }
  func.func @transform_0(%arg0: i32) -> (i32, i32) {
    %c0_i32 = arith.constant 0 : i32
    %c0_i32_0 = arith.constant 0 : i32
    return %arg0, %c0_i32 : i32, i32
  }
  func.func @transform_1(%arg0: i32) -> (i32, i32) {
    %c0_i32 = arith.constant 0 : i32
    %c0_i32_0 = arith.constant 0 : i32
    return %arg0, %c0_i32 : i32, i32
  }
}

</mosaic_0001>

<bundles_post_ra>
// kernel: tpu_custom_call.1
= control target key start
LH: loop header
LB: loop body
LE: loop exit
PB: predicated region body
PF: predicated region fallthrough
CT: control target
= control target key end

     0   :  { %6 = vsyncpa [#allocation3], 0  ;;  %s106_s0 = inlined_call_operand.hbm [shape: f32[2,1024], index: 0, kind: input, shape index: {}]   ;;  %s107_s1 = inlined_call_operand.hbm [shape: f32[2,1024], index: 1, kind: output, shape index: {}]  }
   0x1   :  { %7 = vsyncpa [#allocation4], 0  ;;  %s88_s6 = smov [#allocation2]  }
   0x2   :  { %s14_s7 = sshll.u32 %s88_s6, 4  ;;  %s15_s7 = int_to_ptr.vmem [resolvable:$true] %s14_s7 }
   0x3   :  { %s52_s8 = scalar_lea.vmem %s15_s7, 256  ;;  %p57_p1 = scmp.lt.s32.totalorder %s15_s7, %s15_s7 }
   0x4   :  { %p53_p0 = scmp.ne.s32.totalorder %s15_s7, %s52_s8  ;;  %p58_p2 = scmp.lt.s32.totalorder %s52_s8, %s52_s8 }
   0x6   :  { %p59_p3 = por %p58_p2, %p57_p1 }
   0x8   :  { %p60_p4 = pnand %p59_p3, %p53_p0 }
   0xa   :  { %63 = shalt.err (!%p60_p4)
}
   0xb   :  { %17 = dma.hbm_to_vmem [thread:$0]  %s106_s0, 256, %s15_s7, [#allocation3]  }
   0xc   :  { %84 = dma.done.wait [#allocation3], 256  }
   0xd   :  { %85 = vsyncadd [#allocation3], 4294967040  ;;  %s89_s11 = smov [#allocation5]   ;;  %v21_v0 = vld [vmem:[#allocation2] sm:$0xff]  ;;  %v22_v1 = vld [vmem:[#allocation2 + $0x8] sm:$0xff] }
   0xe   :  { %s33_s12 = sshll.u32 %s89_s11, 4  ;;  %v23_v2 = vmax.f32 %v21_v0, 0.0  ;;  %v24_v3 = vmax.f32 %v22_v1, 0.0  ;;  %s34_s12 = int_to_ptr.vmem [resolvable:$true] %s33_s12 }
   0xf   :  { %s64_s13 = scalar_lea.vmem %s34_s12, 256  ;;  %p69_p6 = scmp.lt.s32.totalorder %s34_s12, %s34_s12 }
  0x10   :  { %25 = vst [vmem:[#allocation5] sm:$0xff] %v23_v2  ;;  %26 = vst [vmem:[#allocation5 + $0x8] sm:$0xff] %v24_v3  ;;  %p65_p5 = scmp.ne.s32.totalorder %s34_s12, %s64_s13  ;;  %p70_p7 = scmp.lt.s32.totalorder %s64_s13, %s64_s13 }
  0x12   :  { %p71_p8 = por %p70_p7, %p69_p6 }
  0x14   :  { %p72_p9 = pnand %p71_p8, %p65_p5 }
  0x16   :  { %75 = shalt.err (!%p72_p9)
}
  0x17   :  { %36 = dma.vmem_to_hbm [thread:$0]  %s34_s12, 256, %s107_s1, [#allocation4]  }
  0x18   :  { %86 = dma.done.wait [#allocation4], 256  }
  0x19   :  { %87 = vsyncadd [#allocation4], 4294967040 }
  0x1a   :  { %40 = vsyncpa [#allocation3], 1 }
  0x1b   :  { %41 = vsyncpa [#allocation4], 1 }

</bundles_post_ra>
